<compile_context>
chip_gen: v5e
topology: v5e:2x2
jax: 0.10.0
libtpu: 0.0.40
codegen_flags: <defaults>
</compile_context>

<pallas_src>
import jax
import jax.numpy as jnp
from jax.experimental import pallas as pl
from jax.experimental.pallas import tpu as pltpu

BN_EPS = 1e-5


def _round_up(n, m):
    return ((n + m - 1) // m) * m


def _domain_net_kernel(x_ref, w1_ref, b1_ref, w2_ref, b2_ref, o_ref):
    # fc1 (BN + bias pre-folded into w1/b1): (TB, F) @ (F, Hp) + (1, Hp)
    h = jnp.dot(x_ref[...], w1_ref[...], preferred_element_type=jnp.float32)
    h = jnp.maximum(h + b1_ref[...], 0.0)            # relu1
    # fc2: (TB, Hp) @ (Hp, Cp) + (1, Cp)
    o_ref[...] = (
        jnp.dot(h, w2_ref[...], preferred_element_type=jnp.float32) + b2_ref[...]
    )


def domain_net_small_image(x, params, block_b=512):
    """Forward pass of DomainNetSmallImage (bigger_discrim=False).

    x: (B, input_size) float32
    params: dict with w1 (in,H), b1 (1,H), gamma/beta/mean/var (1,H),
            w2 (H,C), b2 (1,C)      (Linear weights stored pre-transposed)
    returns: (B, C) float32 logits
    """
    x = x.astype(jnp.float32)
    B, F = x.shape
    H = params["w1"].shape[1]
    C = params["w2"].shape[1]

    # --- Fold eval-mode BatchNorm + fc1 bias into fc1 weight/bias -----------
    inv_std = jax.lax.rsqrt(params["var"].astype(jnp.float32) + BN_EPS)   # (1, H)
    scale = params["gamma"].astype(jnp.float32) * inv_std                 # (1, H)
    w1f = params["w1"].astype(jnp.float32) * scale                        # (F, H)
    b1f = (params["b1"].astype(jnp.float32) - params["mean"].astype(jnp.float32)) \
        * scale + params["beta"].astype(jnp.float32)                      # (1, H)

    # --- Pad hidden / class dims to multiples of 128 (lane-dense tiles) -----
    Hp = _round_up(H, 128)
    Cp = _round_up(C, 128)
    w1p = jnp.zeros((F, Hp), jnp.float32).at[:, :H].set(w1f)
    b1p = jnp.zeros((1, Hp), jnp.float32).at[:, :H].set(b1f)
    w2p = jnp.zeros((Hp, Cp), jnp.float32).at[:H, :C].set(
        params["w2"].astype(jnp.float32))
    b2p = jnp.zeros((1, Cp), jnp.float32).at[:, :C].set(
        params["b2"].astype(jnp.float32))

    # --- Grid over batch; weights stay VMEM-resident across tiles -----------
    tb = min(block_b, _round_up(B, 8))
    Bp = _round_up(B, tb)
    xp = x if Bp == B else jnp.zeros((Bp, F), jnp.float32).at[:B].set(x)
    grid = (Bp // tb,)

    cost = pl.CostEstimate(
        flops=2 * Bp * (F * Hp + Hp * Cp),
        bytes_accessed=4 * (Bp * F + F * Hp + Hp + Hp * Cp + Cp + Bp * Cp),
        transcendentals=0,
    )

    out = pl.pallas_call(
        _domain_net_kernel,
        out_shape=jax.ShapeDtypeStruct((Bp, Cp), jnp.float32),
        grid_spec=pltpu.PrefetchScalarGridSpec(
            num_scalar_prefetch=0,
            grid=grid,
            in_specs=[
                pl.BlockSpec((tb, F), lambda i: (i, 0)),    # x: batch-tiled
                pl.BlockSpec((F, Hp), lambda i: (0, 0)),    # w1' resident
                pl.BlockSpec((1, Hp), lambda i: (0, 0)),    # b1' resident
                pl.BlockSpec((Hp, Cp), lambda i: (0, 0)),   # w2  resident
                pl.BlockSpec((1, Cp), lambda i: (0, 0)),    # b2  resident
            ],
            out_specs=pl.BlockSpec((tb, Cp), lambda i: (i, 0)),
        ),
        compiler_params=pltpu.CompilerParams(
            dimension_semantics=("parallel",)),
        cost_estimate=cost,
    )(xp, w1p, b1p, w2p, b2p)

    return out[:B, :C]


def init_params(key, input_size=128, hidden_size=100, num_classes=2):
    """Deterministic synthetic parameters matching the module's shapes."""
    ks = jax.random.split(key, 8)
    # nn.Linear(input_size, hidden_size): weight (H, in) -> stored transposed (in, H)
    w1 = jax.random.normal(ks[0], (input_size, hidden_size), jnp.float32) * 0.05
    b1 = jax.random.normal(ks[1], (1, hidden_size), jnp.float32) * 0.05
    # nn.BatchNorm1d(hidden_size): weight/bias/running_mean/running_var
    gamma = 1.0 + 0.1 * jax.random.normal(ks[2], (1, hidden_size), jnp.float32)
    beta = 0.1 * jax.random.normal(ks[3], (1, hidden_size), jnp.float32)
    mean = 0.1 * jax.random.normal(ks[4], (1, hidden_size), jnp.float32)
    var = jnp.abs(1.0 + 0.1 * jax.random.normal(ks[5], (1, hidden_size), jnp.float32))
    # nn.Linear(hidden_size, num_classes): weight (C, H) -> stored transposed (H, C)
    w2 = jax.random.normal(ks[6], (hidden_size, num_classes), jnp.float32) * 0.05
    b2 = jax.random.normal(ks[7], (1, num_classes), jnp.float32) * 0.05
    return dict(w1=w1, b1=b1, gamma=gamma, beta=beta, mean=mean, var=var,
                w2=w2, b2=b2)


def reference_forward(x, p):
    h = x @ p["w1"] + p["b1"]
    h = (h - p["mean"]) * jax.lax.rsqrt(p["var"] + BN_EPS) * p["gamma"] + p["beta"]
    h = jnp.maximum(h, 0.0)
    return h @ p["w2"] + p["b2"]


if __name__ == "__main__":
    key = jax.random.PRNGKey(0)
    kx, kp = jax.random.split(key)

    batch, input_size, hidden_size, num_classes = 8, 128, 100, 2
    x = jax.random.normal(kx, (batch, input_size), jnp.float32)
    params = init_params(kp, input_size, hidden_size, num_classes)

    out = jax.block_until_ready(domain_net_small_image(x, params))
    ref = jax.block_until_ready(reference_forward(x, params))

    assert out.shape == (batch, num_classes)
    assert jnp.allclose(out, ref, atol=1e-4, rtol=1e-4)

    print("KERNEL_OK")
</pallas_src>

<mosaic_0001>
module attributes {stable_mosaic.version = 11 : i64} {
  func.func @_domain_net_kernel(%arg0: i32, %arg1: memref<8x128xf32, #tpu.memory_space<vmem>>, %arg2: memref<128x128xf32, #tpu.memory_space<vmem>>, %arg3: memref<1x128xf32, #tpu.memory_space<vmem>>, %arg4: memref<128x128xf32, #tpu.memory_space<vmem>>, %arg5: memref<1x128xf32, #tpu.memory_space<vmem>>, %arg6: memref<8x128xf32, #tpu.memory_space<vmem>>) attributes {dimension_semantics = [#tpu.dimension_semantics<parallel>], iteration_bounds = array<i64: 1>, scalar_prefetch = 0 : i64, scratch_operands = 0 : i64, tpu.core_type = #tpu.core_type<tc>, window_params = [{transform_indices = @transform_0, window_bounds = array<i64: 8, 128>}, {pipeline_mode = #tpu.pipeline_mode<synchronous>, transform_indices = @transform_1, window_bounds = array<i64: 128, 128>}, {pipeline_mode = #tpu.pipeline_mode<synchronous>, transform_indices = @transform_2, window_bounds = array<i64: 1, 128>}, {pipeline_mode = #tpu.pipeline_mode<synchronous>, transform_indices = @transform_3, window_bounds = array<i64: 128, 128>}, {pipeline_mode = #tpu.pipeline_mode<synchronous>, transform_indices = @transform_4, window_bounds = array<i64: 1, 128>}, {transform_indices = @transform_5, window_bounds = array<i64: 8, 128>}]} {
    %c0 = arith.constant 0 : index
    %c0_0 = arith.constant 0 : index
    %0 = vector.load %arg1[%c0, %c0_0] : memref<8x128xf32, #tpu.memory_space<vmem>>, vector<8x128xf32>
    %c0_1 = arith.constant 0 : index
    %c0_2 = arith.constant 0 : index
    %1 = vector.load %arg2[%c0_1, %c0_2] : memref<128x128xf32, #tpu.memory_space<vmem>>, vector<128x128xf32>
    %cst = arith.constant dense<0.000000e+00> : vector<8x128xf32>
    %2 = tpu.matmul %0, %1, %cst {dimension_numbers = #tpu.dot_dimension_numbers<[1], [0], [0], [1], [0, 0, 1, 1], [], []>} : vector<8x128xf32>, vector<128x128xf32>, vector<8x128xf32> -> vector<8x128xf32>
    %c0_3 = arith.constant 0 : index
    %c0_4 = arith.constant 0 : index
    %3 = vector.load %arg3[%c0_3, %c0_4] : memref<1x128xf32, #tpu.memory_space<vmem>>, vector<1x128xf32>
    %4 = vector.broadcast %3 : vector<1x128xf32> to vector<8x128xf32>
    %5 = arith.addf %2, %4 : vector<8x128xf32>
    %cst_5 = arith.constant 0.000000e+00 : f32
    %6 = vector.broadcast %cst_5 : f32 to vector<8x128xf32>
    %7 = arith.maximumf %5, %6 : vector<8x128xf32>
    %c0_6 = arith.constant 0 : index
    %c0_7 = arith.constant 0 : index
    %8 = vector.load %arg4[%c0_6, %c0_7] : memref<128x128xf32, #tpu.memory_space<vmem>>, vector<128x128xf32>
    %cst_8 = arith.constant dense<0.000000e+00> : vector<8x128xf32>
    %9 = tpu.matmul %7, %8, %cst_8 {dimension_numbers = #tpu.dot_dimension_numbers<[1], [0], [0], [1], [0, 0, 1, 1], [], []>} : vector<8x128xf32>, vector<128x128xf32>, vector<8x128xf32> -> vector<8x128xf32>
    %c0_9 = arith.constant 0 : index
    %c0_10 = arith.constant 0 : index
    %10 = vector.load %arg5[%c0_9, %c0_10] : memref<1x128xf32, #tpu.memory_space<vmem>>, vector<1x128xf32>
    %11 = vector.broadcast %10 : vector<1x128xf32> to vector<8x128xf32>
    %12 = arith.addf %9, %11 : vector<8x128xf32>
    %c0_11 = arith.constant 0 : index
    %c0_12 = arith.constant 0 : index
    %13 = vector.load %arg6[%c0_11, %c0_12] : memref<8x128xf32, #tpu.memory_space<vmem>>, vector<8x128xf32>
    tpu.vector_store %arg6[%c0_11, %c0_12], %12 {strides = array<i32>} : memref<8x128xf32, #tpu.memory_space<vmem>>, vector<8x128xf32>,
    return
  }
  func.func @transform_0(%arg0: i32) -> (i32, i32) {
    %c0_i32 = arith.constant 0 : i32
    %c0_i32_0 = arith.constant 0 : i32
    return %arg0, %c0_i32 : i32, i32
  }
  func.func @transform_1(%arg0: i32) -> (i32, i32) {
    %c0_i32 = arith.constant 0 : i32
    %c0_i32_0 = arith.constant 0 : i32
    %c0_i32_1 = arith.constant 0 : i32
    return %c0_i32, %c0_i32_0 : i32, i32
  }
  func.func @transform_2(%arg0: i32) -> (i32, i32) {
    %c0_i32 = arith.constant 0 : i32
    %c0_i32_0 = arith.constant 0 : i32
    %c0_i32_1 = arith.constant 0 : i32
    return %c0_i32, %c0_i32_0 : i32, i32
  }
  func.func @transform_3(%arg0: i32) -> (i32, i32) {
    %c0_i32 = arith.constant 0 : i32
    %c0_i32_0 = arith.constant 0 : i32
    %c0_i32_1 = arith.constant 0 : i32
    return %c0_i32, %c0_i32_0 : i32, i32
  }
  func.func @transform_4(%arg0: i32) -> (i32, i32) {
    %c0_i32 = arith.constant 0 : i32
    %c0_i32_0 = arith.constant 0 : i32
    %c0_i32_1 = arith.constant 0 : i32
    return %c0_i32, %c0_i32_0 : i32, i32
  }
  func.func @transform_5(%arg0: i32) -> (i32, i32) {
    %c0_i32 = arith.constant 0 : i32
    %c0_i32_0 = arith.constant 0 : i32
    return %arg0, %c0_i32 : i32, i32
  }
}

</mosaic_0001>

<bundles_post_ra>
// kernel: tpu_custom_call.1
= control target key start
LH: loop header
LB: loop body
LE: loop exit
PB: predicated region body
PF: predicated region fallthrough
CT: control target
= control target key end

     0   :  { %10 = vsyncpa [#allocation3], 0  ;;  %s331_s0 = inlined_call_operand.hbm [shape: f32[8,128], index: 0, kind: input, shape index: {}]   ;;  %s332_s1 = inlined_call_operand.hbm [shape: f32[128,128], index: 1, kind: input, shape index: {}]   ;;  %s333_s2 = inlined_call_operand.vmem [shape: f32[1,128], index: 2, kind: input, shape index: {}]   ;;  %s334_s3 = inlined_call_operand.hbm [shape: f32[128,128], index: 3, kind: input, shape index: {}]   ;;  %s335_s4 = inlined_call_operand.vmem [shape: f32[1,128], index: 4, kind: input, shape index: {}]   ;;  %s336_s5 = inlined_call_operand.hbm [shape: f32[8,128], index: 5, kind: output, shape index: {}]  }
   0x1   :  { %11 = vsyncpa [#allocation6], 0  ;;  %s28_s20 = sshll.u32 %s332_s1, 4  ;;  %s29_s20 = int_to_ptr.hbm [resolvable:$true] %s28_s20 }
   0x2   :  { %12 = vsyncpa [#allocation4], 0  ;;  %s277_s21 = smov [#allocation5]   ;;  %s18_s25 = sshll.u32 %s331_s0, 4  ;;  %s19_s25 = int_to_ptr.hbm [resolvable:$true] %s18_s25 }
   0x3   :  { %s30_s22 = sshll.u32 %s277_s21, 4  ;;  %s278_s26 = smov 128   ;;  %s31_s22 = int_to_ptr.vmem [resolvable:$true] %s30_s22 }
   0x4   :  { %s279_s27 = smov 8   ;;  %s280_s28 = smov [#allocation2]  }
   0x5   :  { %36 = dma.hbm_to_vmem [thread:$0]  %s29_s20, 2048, %s31_s22, [#allocation6], %s278_s26, %s278_s26, %s279_s27  }
   0x6   :  { %s20_s29 = sshll.u32 %s280_s28, 4  ;;  %s43_s7 = sshll.u32 %s334_s3, 4  ;;  %s21_s29 = int_to_ptr.vmem [resolvable:$true] %s20_s29  ;;  %s44_s7 = int_to_ptr.hbm [resolvable:$true] %s43_s7 }
   0x7   :  { %23 = dma.hbm_to_vmem [thread:$0]  %s19_s25, 128, %s21_s29, [#allocation3]  }
   0x8   :  { %s281_s1 = smov [#allocation7]  }
   0x9   :  { %s45_s8 = sshll.u32 %s281_s1, 4  ;;  %s46_s8 = int_to_ptr.vmem [resolvable:$true] %s45_s8 }
   0xa   :  { %51 = dma.hbm_to_vmem [thread:$0]  %s44_s7, 2048, %s46_s8, [#allocation6], %s278_s26, %s278_s26, %s279_s27  }
   0xb   :  { %271 = dma.done.wait [#allocation3], 128  }
   0xc   :  { %272 = vsyncadd [#allocation3], 4294967168 }
   0xd   :  { %273 = dma.done.wait [#allocation6], 4096  }
   0xe   :  { %274 = vsyncadd [#allocation6], 4294963200  ;;  %v82_v0 = vld [vmem:[#allocation5 + $0x78] sm:$0xff]  ;;  %v81_v1 = vld [vmem:[#allocation5 + $0x70] sm:$0xff]  ;;  %s282_s11 = smov [#allocation8]   ;;  %s156_s15 = sshll.u32 %s336_s5, 4  ;;  %s157_s15 = int_to_ptr.hbm [resolvable:$true] %s156_s15 }
   0xf   :  { %87 = vmatpush.msra.mxu0 %v82_v0  ;;  %v80_v2 = vld [vmem:[#allocation5 + $0x68] sm:$0xff]  ;;  %v79_v3 = vld [vmem:[#allocation5 + $0x60] sm:$0xff]  ;;  %v123_v4 = vld [vmem:[#allocation7 + $0x78] sm:$0xff]  ;;  %s154_s12 = sshll.u32 %s282_s11, 4  ;;  %s155_s12 = int_to_ptr.vmem [resolvable:$true] %s154_s12 }
  0x10   :  { %v78_v5 = vld [vmem:[#allocation5 + $0x58] sm:$0xff]  ;;  %128 = vmatpush.msra.mxu1 %v123_v4  ;;  %v122_v6 = vld [vmem:[#allocation7 + $0x70] sm:$0xff]  ;;  %v121_v7 = vld [vmem:[#allocation7 + $0x68] sm:$0xff] }
  0x11   :  { %88 = vmatpush.msra.mxu0 %v81_v1  ;;  %v77_v8 = vld [vmem:[#allocation5 + $0x50] sm:$0xff]  ;;  %v120_v9 = vld [vmem:[#allocation7 + $0x60] sm:$0xff]  ;;  %v76_v10 = vld [vmem:[#allocation5 + $0x48] sm:$0xff] }
  0x12   :  { %129 = vmatpush.msra.mxu1 %v122_v6  ;;  %v119_v11 = vld [vmem:[#allocation7 + $0x58] sm:$0xff]  ;;  %v75_v12 = vld [vmem:[#allocation5 + $0x40] sm:$0xff]  ;;  %v118_v13 = vld [vmem:[#allocation7 + $0x50] sm:$0xff] }
  0x13   :  { %89 = vmatpush.msra.mxu0 %v80_v2  ;;  %v74_v14 = vld [vmem:[#allocation5 + $0x38] sm:$0xff]  ;;  %v117_v15 = vld [vmem:[#allocation7 + $0x48] sm:$0xff]  ;;  %v73_v16 = vld [vmem:[#allocation5 + $0x30] sm:$0xff] }
  0x14   :  { %130 = vmatpush.msra.mxu1 %v121_v7  ;;  %v116_v17 = vld [vmem:[#allocation7 + $0x40] sm:$0xff]  ;;  %v72_v18 = vld [vmem:[#allocation5 + $0x28] sm:$0xff]  ;;  %v115_v19 = vld [vmem:[#allocation7 + $0x38] sm:$0xff] }
  0x15   :  { %90 = vmatpush.msra.mxu0 %v79_v3  ;;  %v71_v20 = vld [vmem:[#allocation5 + $0x20] sm:$0xff]  ;;  %v114_v21 = vld [vmem:[#allocation7 + $0x30] sm:$0xff]  ;;  %v70_v22 = vld [vmem:[#allocation5 + $0x18] sm:$0xff] }
  0x16   :  { %131 = vmatpush.msra.mxu1 %v120_v9  ;;  %v113_v23 = vld [vmem:[#allocation7 + $0x28] sm:$0xff]  ;;  %v69_v24 = vld [vmem:[#allocation5 + $0x10] sm:$0xff]  ;;  %v112_v25 = vld [vmem:[#allocation7 + $0x20] sm:$0xff] }
  0x17   :  { %91 = vmatpush.msra.mxu0 %v78_v5  ;;  %v68_v26 = vld [vmem:[#allocation5 + $0x8] sm:$0xff]  ;;  %v111_v27 = vld [vmem:[#allocation7 + $0x18] sm:$0xff]  ;;  %v67_v28 = vld [vmem:[#allocation5] sm:$0xff] }
  0x18   :  { %132 = vmatpush.msra.mxu1 %v119_v11  ;;  %v66_v29 = vld [vmem:[#allocation2] sm:$0xff]  ;;  %v110_v30 = vld [vmem:[#allocation7 + $0x10] sm:$0xff]  ;;  %v109_v31 = vld [vmem:[#allocation7 + $0x8] sm:$0xff] }
  0x19   :  { %92 = vmatpush.msra.mxu0 %v77_v8  ;;  %v108_v32 = vld [vmem:[#allocation7] sm:$0xff]  ;;  %v173_v33 = vld [vmem:[%s333_s2] ss:$0 sm:$0xff] }
  0x1a   :  { %133 = vmatpush.msra.mxu1 %v118_v13  ;;  %v174_v37 = vld [vmem:[%s335_s4] ss:$0 sm:$0xff] }
  0x1b   :  { %93 = vmatpush.msra.mxu0 %v76_v10 }
  0x1c   :  { %134 = vmatpush.msra.mxu1 %v117_v15 }
  0x1d   :  { %94 = vmatpush.msra.mxu0 %v75_v12 }
  0x1e   :  { %135 = vmatpush.msra.mxu1 %v116_v17 }
  0x1f   :  { %95 = vmatpush.msra.mxu0 %v74_v14 }
  0x20   :  { %136 = vmatpush.msra.mxu1 %v115_v19 }
  0x21   :  { %96 = vmatpush.msra.mxu0 %v73_v16 }
  0x22   :  { %137 = vmatpush.msra.mxu1 %v114_v21 }
  0x23   :  { %97 = vmatpush.msra.mxu0 %v72_v18 }
  0x24   :  { %138 = vmatpush.msra.mxu1 %v113_v23 }
  0x25   :  { %98 = vmatpush.msra.mxu0 %v71_v20 }
  0x26   :  { %139 = vmatpush.msra.mxu1 %v112_v25 }
  0x27   :  { %99 = vmatpush.msra.mxu0 %v70_v22 }
  0x28   :  { %140 = vmatpush.msra.mxu1 %v111_v27 }
  0x29   :  { %100 = vmatpush.msra.mxu0 %v69_v24 }
  0x2a   :  { %141 = vmatpush.msra.mxu1 %v110_v30 }
  0x2b   :  { %101 = vmatpush.msra.mxu0 %v68_v26 }
  0x2c   :  { %142 = vmatpush.msra.mxu1 %v109_v31 }
  0x2d   :  { %102 = vmatpush.msra.mxu0 %v67_v28 }
  0x2e   :  { %103 = vmatmul.f32.vlgmr.msra.gmra.mxu0 %v66_v29  ;;  %143 = vmatpush.msra.mxu1 %v108_v32 }
  0xab   :  { %v104_v34 = vpop.f32.mrf.mxu0 }
  0xac   :  { %v105_v35 = vadd.f32 %v173_v33, %v104_v34 }
  0xae   :  { %v107_v36 = vmax.f32 %v105_v35, 0.0 }
  0xb0   :  { %144 = vmatmul.f32.vlgmr.msra.gmra.mxu1 %v107_v36 }
 0x12d   :  { %v145_v38 = vpop.f32.mrf.mxu1 }
 0x12e   :  { %v146_v39 = vadd.f32 %v174_v37, %v145_v38 }
 0x130   :  { %148 = vst [vmem:[#allocation8] sm:$0xff] %v146_v39 }
 0x131   :  { %159 = dma.vmem_to_hbm [thread:$0]  %s155_s12, 128, %s157_s15, [#allocation4]  }
 0x132   :  { %275 = dma.done.wait [#allocation4], 128  }
 0x133   :  { %276 = vsyncadd [#allocation4], 4294967168 }
 0x134   :  { %164 = vsyncpa [#allocation3], 1 }
 0x135   :  { %165 = vsyncpa [#allocation6], 1 }
 0x136   :  { %166 = vsyncpa [#allocation4], 1 }

</bundles_post_ra>
